<compile_context>
chip_gen: v7x
topology: tpu7x:2x2x1
jax: 0.10.0
libtpu: 0.0.40
codegen_flags: <defaults>
</compile_context>

<pallas_src>
import math

import jax
import jax.numpy as jnp
from jax.experimental import pallas as pl
from jax.experimental.pallas import tpu as pltpu

_INV_SQRT2 = 1.0 / math.sqrt(2.0)


# ----------------------------------------------------------------------------
# Kernels
# ----------------------------------------------------------------------------
def _gelu_exact(h):
    # Exact GELU (nn.GELU default): 0.5 * x * (1 + erf(x / sqrt(2))).
    return 0.5 * h * (1.0 + jax.lax.erf(h * _INV_SQRT2))


def _mlp_kernel_resident(x_ref, w1_ref, b1_ref, w2_ref, b2_ref, o_ref):
    """Full hidden dim per step; weights VMEM-resident (constant index maps)."""
    h = jnp.dot(x_ref[...], w1_ref[...], preferred_element_type=jnp.float32)
    h = _gelu_exact(h + b1_ref[...])
    # Cast back to the weight dtype so fc2 runs at full MXU rate (bf16 path);
    # accumulation stays f32 via preferred_element_type.
    h = h.astype(w2_ref.dtype)
    out = jnp.dot(h, w2_ref[...], preferred_element_type=jnp.float32)
    o_ref[...] = (out + b2_ref[...]).astype(o_ref.dtype)


def _mlp_kernel_htiled(x_ref, w1_ref, b1_ref, w2_ref, b2_ref, o_ref, acc_ref):
    """One (row-tile, H-chunk) step; accumulates fc2 partials into acc_ref."""
    k = pl.program_id(1)

    h = jnp.dot(x_ref[...], w1_ref[...], preferred_element_type=jnp.float32)
    h = _gelu_exact(h + b1_ref[...])
    h = h.astype(w2_ref.dtype)
    partial = jnp.dot(h, w2_ref[...], preferred_element_type=jnp.float32)

    @pl.when(k == 0)
    def _first():
        acc_ref[...] = partial          # direct assign; no zero + accumulate

    @pl.when(k != 0)
    def _accumulate():
        acc_ref[...] = acc_ref[...] + partial

    @pl.when(k == pl.num_programs(1) - 1)
    def _finalize():
        o_ref[...] = (acc_ref[...] + b2_ref[...]).astype(o_ref.dtype)


# ----------------------------------------------------------------------------
# Tiling helpers
# ----------------------------------------------------------------------------
def _cdiv(a, b):
    return (a + b - 1) // b


def _round_up(x, m):
    return _cdiv(x, m) * m


def _sublane_multiple(dtype):
    bits = jnp.dtype(dtype).itemsize * 8
    return max(8, 256 // bits)          # 8 (f32) / 16 (bf16) / 32 (int8, fp8)


def _usable_vmem_bytes():
    cap = None
    try:
        info = pltpu.get_tpu_info()
        cap = getattr(info, "vmem_capacity_bytes", None)
    except Exception:
        cap = None
    if not cap:
        cap = 64 * 2 ** 20              # conservative (v7x per-core) fallback
    return int(cap) * 3 // 4            # headroom for compiler-internal scratch


def _hidden_chunk_candidates(H):
    """H first (residency), then 128-multiples dividing H, descending."""
    cands = [H]
    for mult in range(H // 128, 0, -1):
        c = mult * 128
        if c < H and H % c == 0:
            cands.append(c)
    return cands


# ----------------------------------------------------------------------------
# Wrapper
# ----------------------------------------------------------------------------
def mlp_pallas(x, w1, b1, w2, b2, *, tm=None, bh=None):
    """MLP forward: GELU(x @ W1 + b1) @ W2 + b2  (torch Mlp with nn.GELU()).

    x: (..., D); w1: (D, H); b1: (H,); w2: (H, D_out); b2: (D_out,).
    Weights are stored transposed vs torch (W1 = fc1.weight.T, ...).
    tm: row tile (auto if None); bh: hidden-dim chunk (auto; bh == H keeps the
    weights VMEM-resident with constant index maps).
    """
    *lead, D = x.shape
    H = w1.shape[1]
    D_out = w2.shape[1]
    M = 1
    for s in lead:
        M *= s
    x2d = x.reshape(M, D)

    x_isz = jnp.dtype(x.dtype).itemsize
    w_isz = jnp.dtype(w1.dtype).itemsize
    sub = _sublane_multiple(x.dtype)
    usable = _usable_vmem_bytes()

    def est_bytes(tm_, bh_):
        resident = bh_ >= H
        return (2 * tm_ * (D + D_out) * x_isz                         # x / out tiles (2 bufs)
                + 2 * (D * bh_ + bh_ + bh_ * D_out + D_out) * w_isz    # W1,b1,W2,b2 (2 bufs)
                + tm_ * bh_ * 4                                        # f32 GELU intermediate
                + (0 if resident else tm_ * D_out * 4))                # f32 accumulator scratch

    # ---- Row tile -----------------------------------------------------------
    tm_req = 512 if tm is None else tm
    if M <= tm_req:
        half = _round_up(_cdiv(M, 2), sub)
        if M > sub and half < M:
            tm_eff = half               # >= 2 row tiles so both v7x cores get work
        else:
            tm_eff = M                  # single full-extent tile (any M allowed)
    else:
        tm_eff = _round_up(tm_req, sub)
        if tm_eff >= M:
            tm_eff = M

    # ---- Hidden-dim chunk ---------------------------------------------------
    if bh is not None:
        bh_eff = bh
        if bh_eff < H:
            assert H % bh_eff == 0, "hidden tile must divide hidden_features"
    else:
        bh_eff = None
        # Prefer weight residency (bh == H); shrink the row tile before giving
        # residency up.
        for tm_try in sorted({tm_eff, 256, 128}, reverse=True):
            if tm_try > tm_eff:
                continue
            if tm_try != tm_eff and tm_try % sub != 0:
                continue
            if est_bytes(tm_try, H) <= usable:
                tm_eff = tm_try
                bh_eff = H
                break
        if bh_eff is None:
            # Weights too big to keep resident: stream them in H-chunks.
            for cand in _hidden_chunk_candidates(H):
                if cand < H and est_bytes(tm_eff, cand) <= usable:
                    bh_eff = cand
                    break
            if bh_eff is None:
                bh_eff = 128 if H % 128 == 0 else H
                while est_bytes(tm_eff, bh_eff) > usable and tm_eff > max(2 * sub, 64):
                    tm_eff = max(_round_up(tm_eff // 2, sub), sub)

    grid_rows = _cdiv(M, tm_eff)

    b1_2d = b1.reshape(1, H)
    b2_2d = b2.reshape(1, D_out)

    vmem_limit = int(min(usable,
                         max(32 * 2 ** 20, est_bytes(tm_eff, bh_eff) + (4 << 20))))

    cost = pl.CostEstimate(
        flops=2 * M * (D * H + H * D_out),
        transcendentals=M * H,
        bytes_accessed=(M * (D + D_out) * x_isz
                        + (D * H + H + H * D_out + D_out) * w_isz),
    )

    if bh_eff >= H:
        # Weights resident: 1-D grid over row tiles, constant weight index maps.
        out2d = pl.pallas_call(
            _mlp_kernel_resident,
            out_shape=jax.ShapeDtypeStruct((M, D_out), x.dtype),
            grid_spec=pltpu.PrefetchScalarGridSpec(
                num_scalar_prefetch=0,
                grid=(grid_rows,),
                in_specs=[
                    pl.BlockSpec((tm_eff, D), lambda i: (i, 0)),        # x row tile
                    pl.BlockSpec((D, H), lambda i: (0, 0)),             # W1 (resident)
                    pl.BlockSpec((1, H), lambda i: (0, 0)),             # b1 (resident)
                    pl.BlockSpec((H, D_out), lambda i: (0, 0)),         # W2 (resident)
                    pl.BlockSpec((1, D_out), lambda i: (0, 0)),         # b2 (resident)
                ],
                out_specs=pl.BlockSpec((tm_eff, D_out), lambda i: (i, 0)),
            ),
            compiler_params=pltpu.CompilerParams(
                dimension_semantics=("parallel",),
                vmem_limit_bytes=vmem_limit,
            ),
            cost_estimate=cost,
        )(x2d, w1, b1_2d, w2, b2_2d)
    else:
        # Weights streamed in H-chunks; f32 accumulator held in VMEM scratch.
        out2d = pl.pallas_call(
            _mlp_kernel_htiled,
            out_shape=jax.ShapeDtypeStruct((M, D_out), x.dtype),
            grid_spec=pltpu.PrefetchScalarGridSpec(
                num_scalar_prefetch=0,
                grid=(grid_rows, H // bh_eff),
                in_specs=[
                    pl.BlockSpec((tm_eff, D), lambda i, k: (i, 0)),      # x row tile
                    pl.BlockSpec((D, bh_eff), lambda i, k: (0, k)),      # W1 H-chunk
                    pl.BlockSpec((1, bh_eff), lambda i, k: (0, k)),      # b1 chunk
                    pl.BlockSpec((bh_eff, D_out), lambda i, k: (k, 0)),  # W2 H-chunk
                    pl.BlockSpec((1, D_out), lambda i, k: (0, 0)),       # b2
                ],
                out_specs=pl.BlockSpec((tm_eff, D_out), lambda i, k: (i, 0)),
                scratch_shapes=[pltpu.VMEM((tm_eff, D_out), jnp.float32)],
            ),
            compiler_params=pltpu.CompilerParams(
                dimension_semantics=("parallel", "arbitrary"),
                vmem_limit_bytes=vmem_limit,
            ),
            cost_estimate=cost,
        )(x2d, w1, b1_2d, w2, b2_2d)

    return out2d.reshape(*lead, D_out)


def mlp_reference(x, w1, b1, w2, b2):
    h = x @ w1 + b1
    h = 0.5 * h * (1.0 + jax.lax.erf(h * _INV_SQRT2))
    return h @ w2 + b2


if __name__ == "__main__":
    key = jax.random.PRNGKey(0)
    kx, kw1, kb1, kw2, kb2, kx2 = jax.random.split(key, 6)

    # Small shapes consistent with the module: tokens (B, N, D).
    B, N = 2, 8
    in_features, hidden_features, out_features = 128, 256, 128

    x = jax.random.normal(kx, (B, N, in_features), jnp.float32)
    w1 = jax.random.normal(kw1, (in_features, hidden_features), jnp.float32) * 0.02
    b1 = jax.random.normal(kb1, (hidden_features,), jnp.float32) * 0.01
    w2 = jax.random.normal(kw2, (hidden_features, out_features), jnp.float32) * 0.02
    b2 = jax.random.normal(kb2, (out_features,), jnp.float32) * 0.01

    # Case 1: f32, weights auto-resident (bh == H), small-M split into 2 row tiles.
    out = jax.block_until_ready(mlp_pallas(x, w1, b1, w2, b2))
    ref = mlp_reference(x, w1, b1, w2, b2)
    assert out.shape == (B, N, out_features)
    assert jnp.allclose(out, ref, atol=1e-5, rtol=1e-5), "mismatch (resident f32)"

    # Case 2: ragged M (544 = 2*256 + 32 -> partial last row tile, no jnp.pad)
    # with the hidden dim forced to stream in 2 chunks (exercises accumulation).
    x2 = jax.random.normal(kx2, (2, 272, in_features), jnp.float32)
    out2 = jax.block_until_ready(mlp_pallas(x2, w1, b1, w2, b2, tm=256, bh=128))
    ref2 = mlp_reference(x2, w1, b1, w2, b2)
    assert out2.shape == (2, 272, out_features)
    assert jnp.allclose(out2, ref2, atol=1e-4, rtol=1e-4), "mismatch (streamed f32)"

    # Case 3: bf16 fast path (bf16 weights/activations, f32 accumulation/GELU).
    xb = x.astype(jnp.bfloat16)
    w1b, b1b = w1.astype(jnp.bfloat16), b1.astype(jnp.bfloat16)
    w2b, b2b = w2.astype(jnp.bfloat16), b2.astype(jnp.bfloat16)
    out3 = jax.block_until_ready(mlp_pallas(xb, w1b, b1b, w2b, b2b))
    ref3 = mlp_reference(xb.astype(jnp.float32), w1b.astype(jnp.float32),
                         b1b.astype(jnp.float32), w2b.astype(jnp.float32),
                         b2b.astype(jnp.float32))
    assert out3.shape == (B, N, out_features)
    assert jnp.allclose(out3.astype(jnp.float32), ref3, atol=2e-2, rtol=2e-2), \
        "mismatch (resident bf16)"

    print("KERNEL_OK")
</pallas_src>

<mosaic_0001>
module attributes {stable_mosaic.version = 11 : i64} {
  func.func @_mlp_kernel_resident(%arg0: i32, %arg1: memref<8x128xf32, #tpu.memory_space<vmem>>, %arg2: memref<128x256xf32, #tpu.memory_space<vmem>>, %arg3: memref<1x256xf32, #tpu.memory_space<vmem>>, %arg4: memref<256x128xf32, #tpu.memory_space<vmem>>, %arg5: memref<1x128xf32, #tpu.memory_space<vmem>>, %arg6: memref<8x128xf32, #tpu.memory_space<vmem>>) attributes {dimension_semantics = [#tpu.dimension_semantics<parallel>], iteration_bounds = array<i64: 2>, scalar_prefetch = 0 : i64, scratch_operands = 0 : i64, tpu.core_type = #tpu.core_type<tc>, window_params = [{transform_indices = @transform_0, window_bounds = array<i64: 8, 128>}, {pipeline_mode = #tpu.pipeline_mode<synchronous>, transform_indices = @transform_1, window_bounds = array<i64: 128, 256>}, {pipeline_mode = #tpu.pipeline_mode<synchronous>, transform_indices = @transform_2, window_bounds = array<i64: 1, 256>}, {pipeline_mode = #tpu.pipeline_mode<synchronous>, transform_indices = @transform_3, window_bounds = array<i64: 256, 128>}, {pipeline_mode = #tpu.pipeline_mode<synchronous>, transform_indices = @transform_4, window_bounds = array<i64: 1, 128>}, {transform_indices = @transform_5, window_bounds = array<i64: 8, 128>}]} {
    %c0 = arith.constant 0 : index
    %c0_0 = arith.constant 0 : index
    %0 = vector.load %arg1[%c0, %c0_0] : memref<8x128xf32, #tpu.memory_space<vmem>>, vector<8x128xf32>
    %c0_1 = arith.constant 0 : index
    %c0_2 = arith.constant 0 : index
    %1 = vector.load %arg2[%c0_1, %c0_2] : memref<128x256xf32, #tpu.memory_space<vmem>>, vector<128x256xf32>
    %cst = arith.constant dense<0.000000e+00> : vector<8x256xf32>
    %2 = tpu.matmul %0, %1, %cst {dimension_numbers = #tpu.dot_dimension_numbers<[1], [0], [0], [1], [0, 0, 1, 1], [], []>} : vector<8x128xf32>, vector<128x256xf32>, vector<8x256xf32> -> vector<8x256xf32>
    %c0_3 = arith.constant 0 : index
    %c0_4 = arith.constant 0 : index
    %3 = vector.load %arg3[%c0_3, %c0_4] : memref<1x256xf32, #tpu.memory_space<vmem>>, vector<1x256xf32>
    %4 = vector.broadcast %3 : vector<1x256xf32> to vector<8x256xf32>
    %5 = arith.addf %2, %4 : vector<8x256xf32>
    %cst_5 = arith.constant 5.000000e-01 : f32
    %6 = vector.broadcast %cst_5 : f32 to vector<8x256xf32>
    %7 = arith.mulf %6, %5 : vector<8x256xf32>
    %cst_6 = arith.constant 0.707106769 : f32
    %8 = vector.broadcast %cst_6 : f32 to vector<8x256xf32>
    %9 = arith.mulf %5, %8 : vector<8x256xf32>
    %10 = math.erf %9 : vector<8x256xf32>
    %cst_7 = arith.constant 1.000000e+00 : f32
    %11 = vector.broadcast %cst_7 : f32 to vector<8x256xf32>
    %12 = arith.addf %11, %10 : vector<8x256xf32>
    %13 = arith.mulf %7, %12 : vector<8x256xf32>
    %c0_8 = arith.constant 0 : index
    %c0_9 = arith.constant 0 : index
    %14 = vector.load %arg4[%c0_8, %c0_9] : memref<256x128xf32, #tpu.memory_space<vmem>>, vector<256x128xf32>
    %cst_10 = arith.constant dense<0.000000e+00> : vector<8x128xf32>
    %15 = tpu.matmul %13, %14, %cst_10 {dimension_numbers = #tpu.dot_dimension_numbers<[1], [0], [0], [1], [0, 0, 1, 1], [], []>} : vector<8x256xf32>, vector<256x128xf32>, vector<8x128xf32> -> vector<8x128xf32>
    %c0_11 = arith.constant 0 : index
    %c0_12 = arith.constant 0 : index
    %16 = vector.load %arg5[%c0_11, %c0_12] : memref<1x128xf32, #tpu.memory_space<vmem>>, vector<1x128xf32>
    %17 = vector.broadcast %16 : vector<1x128xf32> to vector<8x128xf32>
    %18 = arith.addf %15, %17 : vector<8x128xf32>
    %c0_13 = arith.constant 0 : index
    %c0_14 = arith.constant 0 : index
    %19 = vector.load %arg6[%c0_13, %c0_14] : memref<8x128xf32, #tpu.memory_space<vmem>>, vector<8x128xf32>
    tpu.vector_store %arg6[%c0_13, %c0_14], %18 {strides = array<i32>} : memref<8x128xf32, #tpu.memory_space<vmem>>, vector<8x128xf32>,
    return
  }
  func.func @transform_0(%arg0: i32) -> (i32, i32) {
    %c0_i32 = arith.constant 0 : i32
    %c0_i32_0 = arith.constant 0 : i32
    return %arg0, %c0_i32 : i32, i32
  }
  func.func @transform_1(%arg0: i32) -> (i32, i32) {
    %c0_i32 = arith.constant 0 : i32
    %c0_i32_0 = arith.constant 0 : i32
    %c0_i32_1 = arith.constant 0 : i32
    return %c0_i32, %c0_i32_0 : i32, i32
  }
  func.func @transform_2(%arg0: i32) -> (i32, i32) {
    %c0_i32 = arith.constant 0 : i32
    %c0_i32_0 = arith.constant 0 : i32
    %c0_i32_1 = arith.constant 0 : i32
    return %c0_i32, %c0_i32_0 : i32, i32
  }
  func.func @transform_3(%arg0: i32) -> (i32, i32) {
    %c0_i32 = arith.constant 0 : i32
    %c0_i32_0 = arith.constant 0 : i32
    %c0_i32_1 = arith.constant 0 : i32
    return %c0_i32, %c0_i32_0 : i32, i32
  }
  func.func @transform_4(%arg0: i32) -> (i32, i32) {
    %c0_i32 = arith.constant 0 : i32
    %c0_i32_0 = arith.constant 0 : i32
    %c0_i32_1 = arith.constant 0 : i32
    return %c0_i32, %c0_i32_0 : i32, i32
  }
  func.func @transform_5(%arg0: i32) -> (i32, i32) {
    %c0_i32 = arith.constant 0 : i32
    %c0_i32_0 = arith.constant 0 : i32
    return %arg0, %c0_i32 : i32, i32
  }
}

</mosaic_0001>

<bundles_post_ra>
// kernel: tpu_custom_call.1
= control target key start
LH: loop header
LB: loop body
LE: loop exit
PB: predicated region body
PF: predicated region fallthrough
CT: control target
= control target key end

     0   :  { %10 = vsyncpa [#allocation3], 0  ;;  %s1239_s0 = inlined_call_operand.hbm [shape: f32[16,128], index: 0, kind: input, shape index: {}]   ;;  %s1240_s1 = inlined_call_operand.hbm [shape: f32[128,256], index: 1, kind: input, shape index: {}]   ;;  %s1241_s2 = inlined_call_operand.vmem [shape: f32[1,256], index: 2, kind: input, shape index: {}]   ;;  %s1242_s3 = inlined_call_operand.hbm [shape: f32[256,128], index: 3, kind: input, shape index: {}]   ;;  %s1243_s4 = inlined_call_operand.vmem [shape: f32[1,128], index: 4, kind: input, shape index: {}]   ;;  %s1244_s5 = inlined_call_operand.hbm [shape: f32[16,128], index: 5, kind: output, shape index: {}]  }
   0x1   :  { %12 = vsyncpa [#allocation3 + $0x1], 0 }
   0x2   :  { %13 = vsyncpa [#allocation6], 0 }
   0x3   :  { %14 = vsyncpa [#allocation4], 0 }
   0x4   :  { %16 = vsyncpa [#allocation4 + $0x1], 0  ;;  %s997_s18 = smov 0   ;;  %s999_s19 = smov 0  }
   0x5   :  { %s1001_s20 = smov 0   ;;  %s1003_s21 = smov 0  }
   0x6 LB: > { %s1018_s22 = sadd.s32 4294967295, %s956_s21   ;;  %s608_s23 = sadd.s32 4294967294, %s956_s21   ;;  %s956_s21 = sphi %s1003_s21, %s1264_s21   ;;  %s952_s20 = sphi %s1001_s20, %s1263_s20   ;;  %s948_s19 = sphi %s999_s19, %s1262_s19   ;;  %s944_s18 = sphi %s997_s18, %s1261_s18  }
   0x7   : > { %p42_p0 = scmp.ne.s32.totalorder %s948_s19, %s944_s18  ;;  %p1245_p1 = scmp.eq.s32.totalorder %s1018_s22, 0 }
   0x8   : > { %p156_p3 = scmp.eq.s32.totalorder %s608_s23, 1  ;;  %p609_p5 = scmp.ge.s32.totalorder %s956_s21, 1 }
   0x9   : > { %p1027_p4 = por %p1245_p1, %p42_p0  ;;  %p163_p7 = scmp.lt.s32.totalorder %s956_s21, 3 }
   0xa   : > { %p1032_p6 = por %p156_p3, %p42_p0  ;;  %s958_s27 = smov [#allocation5]  }
   0xb   : > { %s1248_s24 = scalar_select %p1027_p4, 1, 0 }
   0xc   : > { %s1249_s25 = scalar_select %p1032_p6, 1, 0 }
   0xd   : > { %p1037_p8 = pnand %p609_p5, %p163_p7  ;;  %s175_s28 = sshll.u32 %s958_s27, 4  ;;  %s1041_s28 = int_to_ptr.vmem [resolvable:$true] %s175_s28 }
   0xe   : > { %s959_s30 = smov [#allocation7]   ;;  %s800_s9 = scalar_lea.hbm %s1240_s1, 4096 }
   0xf   : > { %p736_p9 = pneg %p1037_p8  ;;  %s191_s6 = sshll.u32 %s959_s30, 4  ;;  %s1052_s6 = int_to_ptr.vmem [resolvable:$true] %s191_s6 }
  0x10   : > { %p801_p12 = scmp.ne.s32.totalorder %s1240_s1, %s800_s9  ;;  %p807_p5 = scmp.lt.u32.totalorder %s800_s9, %s1240_s1 }
  0x11   : > { %p1048_p11 = pnand %p736_p9, %p1245_p1 }
  0x13   : > { %p802_p13 = pneg %p1048_p11 }
  0x15   : > { %p803_p0 = pnand %p802_p13, %p801_p12 }
  0x17   : > { %p804_p3 = pneg %p803_p0 }
  0x19   : > { %p809_p7 = pnand %p807_p5, %p804_p3 }
  0x1b   : > { %812 = shalt.err (!%p809_p7)
}
  0x1c   : > { %s813_s14 = scalar_lea.vmem %s1041_s28, 4096  ;;  %p821_p2 = scmp.lt.s32.totalorder %s1041_s28, %s1041_s28 }
  0x1d   : > { %p814_p9 = scmp.ne.s32.totalorder %s1041_s28, %s813_s14  ;;  %p822_p12 = scmp.lt.s32.totalorder %s813_s14, %s813_s14 }
  0x1f   : > { %p816_p10 = pnand %p814_p9, %p802_p13  ;;  %p823_p0 = por %p822_p12, %p821_p2 }
  0x21   : > { %p817_p1 = pneg %p816_p10 }
  0x23   : > { %p824_p6 = pnand %p823_p0, %p817_p1 }
  0x25   : > { %827 = shalt.err (!%p824_p6)
}
  0x26   : > { %s960_s15 = smov 256   ;;  %s961_s16 = smov 16  }
  0x27   : > { %739 = dma.hbm_to_vmem [thread:$0]  (!%p1048_p11), %s1240_s1, 4096, %s1041_s28, [#allocation6], %s960_s15, %s960_s15, %s961_s16  }
  0x28   : > { %s828_s7 = scalar_lea.hbm %s1242_s3, 4096 }
  0x29   : > { %p829_p2 = scmp.ne.s32.totalorder %s1242_s3, %s828_s7  ;;  %p835_p10 = scmp.lt.u32.totalorder %s828_s7, %s1242_s3 }
  0x2b   : > { %p831_p1 = pnand %p829_p2, %p802_p13 }
  0x2d   : > { %p832_p6 = pneg %p831_p1 }
  0x2f   : > { %p837_p3 = pnand %p835_p10, %p832_p6 }
  0x31   : > { %840 = shalt.err (!%p837_p3)
}
  0x32   : > { %s841_s28 = scalar_lea.vmem %s1052_s6, 4096  ;;  %p849_p12 = scmp.lt.s32.totalorder %s1052_s6, %s1052_s6 }
  0x33   : > { %p842_p5 = scmp.ne.s32.totalorder %s1052_s6, %s841_s28  ;;  %p850_p0 = scmp.lt.s32.totalorder %s841_s28, %s841_s28 }
  0x35   : > { %p844_p7 = pnand %p842_p5, %p802_p13  ;;  %p851_p2 = por %p850_p0, %p849_p12 }
  0x37   : > { %p845_p9 = pneg %p844_p7 }
  0x39   : > { %p852_p1 = pnand %p851_p2, %p845_p9 }
  0x3b   : > { %855 = shalt.err (!%p852_p1)
}
  0x3c   : > { %s962_s12 = smov 128   ;;  %s963_s13 = smov 8  }
  0x3d   : > { %742 = dma.hbm_to_vmem [thread:$0]  (!%p1048_p11), %s1242_s3, 4096, %s1052_s6, [#allocation6], %s962_s12, %s962_s12, %s963_s13  }
  0x3e   : > { %s1107_s16 = sadd.s32 1, %s956_s21   ;;  %s29_s23 = sadd.s32 1, %s952_s20 }
  0x3f   : > { %s26_s17 = ssub.s32 %s956_s21, %s1107_s16  ;;  %p36_p6 = scmp.ne.s32.totalorder %s952_s20, %s948_s19 }
  0x40   : > { %p27_p13 = scmp.eq.s32.totalorder %s26_s17, 0  ;;  %p37_p10 = scmp.eq.s32.totalorder %s956_s21, 0 }
  0x41   : > { %p1252_p5 = scmp.eq.s32.totalorder %s1018_s22, 1  ;;  %p753_p9 = scmp.lt.s32.totalorder %s956_s21, 2 }
  0x42   : > { %s1116_s27 = scalar_select %p27_p13, %s952_s20, %s29_s23  }
  0x43   : > { %p38_p3 = por %p37_p10, %p36_p6  ;;  %p1120_p7 = por %p1252_p5, %p36_p6 }
  0x44   : > { %s208_s29 = sand.u32 1, %s952_s20   ;;  %s614_s6 = sshll.u32 %s956_s21, 7 }
  0x45   : > { %s1253_s30 = scalar_select %p1120_p7, 1, 0 }
  0x46   : > { %s613_s7 = sshll.u32 %s208_s29, 3  ;;  %s1130_s10 = scalar_lea.hbm %s1239_s0, %s614_s6 }
  0x47   : > { %s212_s11 = scalar_lea.vmem [#allocation2], %s613_s7  ;;  %p1134_p11 = pnand %p753_p9, %p38_p3 }
  0x48   : > { %s219_s28 = sshll.u32 %s212_s11, 4  ;;  %s209_s13 = scalar_lea.sflag [#allocation3], %s208_s29  ;;  %s1132_s28 = int_to_ptr.vmem [resolvable:$true] %s219_s28 }
  0x49   : > { %s856_s14 = scalar_lea.hbm %s1130_s10, 128  ;;  %p858_p0 = pneg %p1134_p11 }
  0x4a   : > { %p857_p12 = scmp.ne.s32.totalorder %s1130_s10, %s856_s14  ;;  %s861_s23 = scalar_lea.hbm %s1239_s0, 256 }
  0x4b   : > { %p862_p13 = scmp.lt.u32.totalorder %s1130_s10, %s1239_s0  ;;  %p863_p6 = scmp.lt.u32.totalorder %s861_s23, %s856_s14 }
  0x4c   : > { %p859_p2 = pnand %p858_p0, %p857_p12  ;;  %p865_p3 = scmp.lt.u32.totalorder %s856_s14, %s1130_s10 }
  0x4d   : > { %p864_p10 = por %p863_p6, %p862_p13 }
  0x4e   : > { %p860_p1 = pneg %p859_p2 }
  0x4f   : > { %p866_p5 = por %p865_p3, %p864_p10 }
  0x51   : > { %p867_p9 = pnand %p866_p5, %p860_p1 }
  0x53   : > { %870 = shalt.err (!%p867_p9)
}
  0x54   : > { %s871_s29 = scalar_lea.vmem %s1132_s28, 128  ;;  %s964_s8 = smov [#allocation2]  }
  0x55   : > { %p872_p12 = scmp.ne.s32.totalorder %s1132_s28, %s871_s29  ;;  %s876_s9 = sshll.u32 %s964_s8, 4  ;;  %s877_s9 = int_to_ptr.vmem [resolvable:$false] %s876_s9 }
  0x56   : > { %s878_s11 = scalar_lea.vmem %s877_s9, 256  ;;  %p879_p4 = scmp.lt.s32.totalorder %s1132_s28, %s877_s9 }
  0x57   : > { %p874_p2 = pnand %p872_p12, %p858_p0  ;;  %p880_p13 = scmp.lt.s32.totalorder %s878_s11, %s871_s29 }
  0x59   : > { %p875_p7 = pneg %p874_p2  ;;  %p881_p6 = por %p880_p13, %p879_p4 }
  0x5b   : > { %p882_p10 = pnand %p881_p6, %p875_p7 }
  0x5d   : > { %885 = shalt.err (!%p882_p10)
}
  0x5e   : > { %746 = dma.hbm_to_vmem [thread:$0]  (!%p1134_p11), %s1130_s10, 128, %s1132_s28, %s209_s13  }
  0x5f   : > { %228 = sbr.rel (%p1037_p8) target bundleno = 605 (0x25d), region = 40  ;;  %s1166_s14 = sand.u32 (!%p1037_p8), 1, %s948_s19  }
  0x60   : > { %s616_s15 = sshll.u32 (!%p1037_p8), %s1166_s14, 3  ;;  %s231_s17 = scalar_lea.sflag (!%p1037_p8), [#allocation3], %s1166_s14 }
  0x61   : > { %s1172_s23 = scalar_lea.vmem (!%p1037_p8), [#allocation2], %s616_s15  ;;  %p1255_p4 = scmp.ne.s32.totalorder (!%p1037_p8), %s1248_s24, 0 }
  0x66   : > { %931 = dma.done.wait (%p1255_p4), %s231_s17, 128  }
  0x67   : > { %933 = vsyncadd (%p1255_p4), %s231_s17, 4294967168  ;;  %p1256_p7 = scmp.eq.s32.totalorder %s1018_s22, 0 }
  0x69   : > { %935 = dma.done.wait (%p1256_p7), [#allocation6], 8192   ;;  %p1257_p8 = pmov %p1256_p7 }
  0x6a   : > { %v965_v0 = vmov 0.0   ;;  %v271_v1 = vld [vmem:[#allocation5 + $0x8] sm:$0xff]  ;;  %v273_v2 = vld [vmem:[#allocation5 + $0x18] sm:$0xff]  ;;  %v270_v3 = vld [vmem:[#allocation5] sm:$0xff]  ;;  %s622_s12 = sshll.u32 %s1018_s22, 7  ;;  %s268_s13 = scalar_lea.vmem [#allocation8], %s616_s15 }
  0x6b   : > { %937 = vsyncadd (%p1257_p8), [#allocation6], 4294959104  ;;  %378 = vmatprep.mubr.f32.mxu0 %v965_v0  ;;  %v660_v4 = vpack.c.bf16 %v273_v2, %v271_v1  ;;  %v272_v5 = vld [vmem:[#allocation5 + $0x10] sm:$0xff]  ;;  %v275_v6 = vld [vmem:[#allocation5 + $0x28] sm:$0xff]  ;;  %s519_s7 = sshll.u32 %s268_s13, 4  ;;  %s1195_s8 = scalar_lea.hbm %s1244_s5, %s622_s12  ;;  %s1197_s7 = int_to_ptr.vmem [resolvable:$true] %s519_s7 }
  0x6c   : > { %v277_v7 = vld [vmem:[#allocation5 + $0x38] sm:$0xff]  ;;  %v662_v8 = vpack.c.bf16 %v272_v5, %v270_v3  ;;  %v274_v10 = vld [vmem:[#allocation5 + $0x20] sm:$0xff]  ;;  %v276_v11 = vld [vmem:[#allocation5 + $0x30] sm:$0xff]  ;;  %s506_s9 = scalar_lea.sflag [#allocation4], %s1166_s14  ;;  %s886_s11 = scalar_lea.vmem %s1197_s7, 128 }
  0x6d   : > { %v664_v9 = vpack.c.bf16 %v277_v7, %v275_v6  ;;  %v279_v12 = vld [vmem:[#allocation5 + $0x48] sm:$0xff]  ;;  %661 = vmatprep.subr.bf16.mxu0 %v660_v4  ;;  %v281_v13 = vld [vmem:[#allocation5 + $0x58] sm:$0xff]  ;;  %v666_v14 = vpack.c.bf16 %v276_v11, %v274_v10  ;;  %v278_v16 = vld [vmem:[#allocation5 + $0x40] sm:$0xff]  ;;  %p887_p11 = scmp.ne.s32.totalorder %s1197_s7, %s886_s11  ;;  %p1258_p0 = scmp.ne.s32.totalorder %s1253_s30, 0 }
  0x6e   : > { %663 = vmatpush1.bf16.msra.mxu0 %v662_v8  ;;  %v668_v15 = vpack.c.bf16 %v281_v13, %v279_v12  ;;  %v280_v17 = vld [vmem:[#allocation5 + $0x50] sm:$0xff]  ;;  %v283_v18 = vld [vmem:[#allocation5 + $0x68] sm:$0xff]  ;;  %v285_v19 = vld [vmem:[#allocation5 + $0x78] sm:$0xff]  ;;  %s966_s22 = smov [#allocation8]  }
  0x6f   : > { %665 = vmatprep.subr.bf16.mxu0 %v664_v9  ;;  %v670_v20 = vpack.c.bf16 %v280_v17, %v278_v16  ;;  %v672_v21 = vpack.c.bf16 %v285_v19, %v283_v18  ;;  %v282_v22 = vld [vmem:[#allocation5 + $0x60] sm:$0xff]  ;;  %v284_v23 = vld [vmem:[#allocation5 + $0x70] sm:$0xff]  ;;  %v287_v24 = vld [vmem:[#allocation5 + $0x88] sm:$0xff]  ;;  %p888_p1 = pnand %p887_p11, %p1258_p0  ;;  %s890_s15 = sshll.u32 %s966_s22, 4  ;;  %s891_s15 = int_to_ptr.vmem [resolvable:$false] %s890_s15 }
  0x70   : > { %v289_v25 = vld [vmem:[#allocation5 + $0x98] sm:$0xff]  ;;  %v286_v26 = vld [vmem:[#allocation5 + $0x80] sm:$0xff]  ;;  %v288_v27 = vld [vmem:[#allocation5 + $0x90] sm:$0xff]  ;;  %v674_v31 = vpack.c.bf16 %v284_v23, %v282_v22  ;;  %s892_s17 = scalar_lea.vmem %s891_s15, 256  ;;  %p893_p5 = scmp.lt.s32.totalorder %s1197_s7, %s891_s15 }
  0x71   : > { %v411_v28 = vld [vmem:[#allocation7 + $0x80] sm:$0xff]  ;;  %v412_v29 = vld [vmem:[#allocation7 + $0x88] sm:$0xff]  ;;  %v413_v34 = vld [vmem:[#allocation7 + $0x90] sm:$0xff]  ;;  %v676_v36 = vpack.c.bf16 %v289_v25, %v287_v24  ;;  %v678_v46 = vpack.c.bf16 %v288_v27, %v286_v26  ;;  %p889_p3 = pneg %p888_p1  ;;  %p894_p9 = scmp.lt.s32.totalorder %s892_s17, %s886_s11 }
  0x72   : > { %667 = vmatpush1.bf16.msra.mxu0 %v666_v14  ;;  %v395_v30 = vld [vmem:[#allocation7] sm:$0xff]  ;;  %v692_v32 = vpack.c.bf16 %v412_v29, %v411_v28  ;;  %v396_v33 = vld [vmem:[#allocation7 + $0x8] sm:$0xff]  ;;  %v414_v35 = vld [vmem:[#allocation7 + $0x98] sm:$0xff] }
  0x73   : > { %669 = vmatprep.subr.bf16.mxu0 %v668_v15  ;;  %v694_v37 = vpack.c.bf16 %v396_v33, %v395_v30  ;;  %v696_v38 = vpack.c.bf16 %v414_v35, %v413_v34  ;;  %v397_v39 = vld [vmem:[#allocation7 + $0x10] sm:$0xff]  ;;  %v398_v40 = vld [vmem:[#allocation7 + $0x18] sm:$0xff]  ;;  %v415_v41 = vld [vmem:[#allocation7 + $0xa0] sm:$0xff]  ;;  %v304_v34 = vlaneseq  ;;  %p895_p12 = por %p894_p9, %p893_p5 }
  0x74   : > { %v291_v42 = vld [vmem:[#allocation5 + $0xa8] sm:$0xff]  ;;  %v293_v43 = vld [vmem:[#allocation5 + $0xb8] sm:$0xff]  ;;  %693 = vmatprep.subr.bf16.mxu1 %v692_v32  ;;  %v698_v45 = vpack.c.bf16 %v398_v40, %v397_v39  ;;  %v399_v48 = vld [vmem:[#allocation7 + $0x20] sm:$0xff] }
  0x75   : > { %v416_v44 = vld [vmem:[#allocation7 + $0xa8] sm:$0xff]  ;;  %695 = vmatpush3.bf16.msra.mxu1 %v694_v37  ;;  %v680_v50 = vpack.c.bf16 %v293_v43, %v291_v42  ;;  %v290_v51 = vld [vmem:[#allocation5 + $0xa0] sm:$0xff]  ;;  %v292_v52 = vld [vmem:[#allocation5 + $0xb0] sm:$0xff]  ;;  %v305_v35 = vshrl.u32 %v304_v34, 7  ;;  %p896_p2 = pnand %p895_p12, %p889_p3 }
  0x76   : > { %671 = vmatpush1.bf16.msra.mxu0 %v670_v20  ;;  %697 = vmatprep.subr.bf16.mxu1 %v696_v38  ;;  %v700_v47 = vpack.c.bf16 %v416_v44, %v415_v41  ;;  %v400_v49 = vld [vmem:[#allocation7 + $0x28] sm:$0xff]  ;;  %v297_v54 = vld [vmem:[#allocation5 + $0xd8] sm:$0xff]  ;;  %v682_v56 = vpack.c.bf16 %v292_v52, %v290_v51  ;;  %v294_v58 = vld [vmem:[#allocation5 + $0xc0] sm:$0xff] }
  0x77   : > { %673 = vmatprep.subr.bf16.mxu0 %v672_v21  ;;  %v295_v53 = vld [vmem:[#allocation5 + $0xc8] sm:$0xff]  ;;  %v702_v55 = vpack.c.bf16 %v400_v49, %v399_v48  ;;  %v296_v59 = vld [vmem:[#allocation5 + $0xd0] sm:$0xff]  ;;  %v301_v61 = vld [vmem:[#allocation5 + $0xf8] sm:$0xff]  ;;  %v310_v38 = vsub.s32 1, %v305_v35 }
  0x78   : > { %v684_v57 = vpack.c.bf16 %v297_v54, %v295_v53  ;;  %v299_v60 = vld [vmem:[#allocation5 + $0xe8] sm:$0xff]  ;;  %v686_v62 = vpack.c.bf16 %v296_v59, %v294_v58  ;;  %v298_v0 = vld [vmem:[#allocation5 + $0xe0] sm:$0xff]  ;;  %v300_v1 = vld [vmem:[#allocation5 + $0xf0] sm:$0xff] }
  0x79   : > { %699 = vmatpush3.bf16.msra.mxu1 %v698_v45  ;;  %v688_v63 = vpack.c.bf16 %v301_v61, %v299_v60  ;;  %v690_v2 = vpack.c.bf16 %v300_v1, %v298_v0  ;;  %v269_v3 = vld [vmem:[%s1172_s23] sm:$0xff]  ;;  %v419_v10 = vld [vmem:[#allocation7 + $0xc0] sm:$0xff]  ;;  %v420_v11 = vld [vmem:[#allocation7 + $0xc8] sm:$0xff] }
  0x7a   : > { %675 = vmatpush1.bf16.msra.mxu0 %v674_v31  ;;  %701 = vmatprep.subr.bf16.mxu1 %v700_v47  ;;  %v417_v4 = vld [vmem:[#allocation7 + $0xb0] sm:$0xff]  ;;  %v418_v5 = vld [vmem:[#allocation7 + $0xb8] sm:$0xff]  ;;  %v708_v12 = vpack.c.bf16 %v420_v11, %v419_v10  ;;  %v403_v13 = vld [vmem:[#allocation7 + $0x40] sm:$0xff] }
  0x7b   : > { %677 = vmatprep.subr.bf16.mxu0 %v676_v36  ;;  %v704_v6 = vpack.c.bf16 %v418_v5, %v417_v4  ;;  %v401_v7 = vld [vmem:[#allocation7 + $0x30] sm:$0xff]  ;;  %v402_v8 = vld [vmem:[#allocation7 + $0x38] sm:$0xff]  ;;  %v404_v14 = vld [vmem:[#allocation7 + $0x48] sm:$0xff]  ;;  %v306_v36 = vsub.s32 0, %v305_v35 }
  0x7c   : > { %v706_v9 = vpack.c.bf16 %v402_v8, %v401_v7  ;;  %v710_v15 = vpack.c.bf16 %v404_v14, %v403_v13  ;;  %v421_v16 = vld [vmem:[#allocation7 + $0xd0] sm:$0xff]  ;;  %v422_v17 = vld [vmem:[#allocation7 + $0xd8] sm:$0xff]  ;;  %v423_v22 = vld [vmem:[#allocation7 + $0xe0] sm:$0xff] }
  0x7d   : > { %703 = vmatpush3.bf16.msra.mxu1 %v702_v55  ;;  %v712_v18 = vpack.c.bf16 %v422_v17, %v421_v16  ;;  %v405_v19 = vld [vmem:[#allocation7 + $0x50] sm:$0xff]  ;;  %v406_v20 = vld [vmem:[#allocation7 + $0x58] sm:$0xff]  ;;  %v424_v23 = vld [vmem:[#allocation7 + $0xe8] sm:$0xff] }
  0x7e   : > { %679 = vmatpush1.bf16.msra.mxu0 %v678_v46  ;;  %705 = vmatprep.subr.bf16.mxu1 %v704_v6  ;;  %v714_v21 = vpack.c.bf16 %v406_v20, %v405_v19  ;;  %v716_v24 = vpack.c.bf16 %v424_v23, %v423_v22  ;;  %v407_v25 = vld [vmem:[#allocation7 + $0x60] sm:$0xff]  ;;  %v408_v26 = vld [vmem:[#allocation7 + $0x68] sm:$0xff]  ;;  %v425_v28 = vld [vmem:[#allocation7 + $0xf0] sm:$0xff] }
  0x7f   : > { %681 = vmatprep.subr.bf16.mxu0 %v680_v50  ;;  %v718_v27 = vpack.c.bf16 %v408_v26, %v407_v25  ;;  %v426_v29 = vld [vmem:[#allocation7 + $0xf8] sm:$0xff]  ;;  %v409_v31 = vld [vmem:[#allocation7 + $0x70] sm:$0xff] }
  0x80   : > { %v720_v30 = vpack.c.bf16 %v426_v29, %v425_v28  ;;  %v410_v32 = vld [vmem:[#allocation7 + $0x78] sm:$0xff]  ;;  %v302_v37 = vld [vmem:[%s1241_s2] sm:$0x3] }
  0x81   : > { %707 = vmatpush3.bf16.msra.mxu1 %v706_v9  ;;  %v722_v33 = vpack.c.bf16 %v410_v32, %v409_v31  ;;  %v307_v39 = vrot.slane %v302_v37, %v306_v36  ;;  %v311_v40 = vrot.slane %v302_v37, %v310_v38 }
  0x82   : > { %683 = vmatpush1.bf16.msra.mxu0 %v682_v56  ;;  %709 = vmatprep.subr.bf16.mxu1 %v708_v12  ;;  %v620_v56 = vld [vmem:[%s1243_s4] ss:$0 sm:$0xff] }
  0x83   : > { %685 = vmatprep.subr.bf16.mxu0 %v684_v57 }
  0x85   : > { %711 = vmatpush3.bf16.msra.mxu1 %v710_v15 }
  0x86   : > { %687 = vmatpush1.bf16.msra.mxu0 %v686_v62  ;;  %713 = vmatprep.subr.bf16.mxu1 %v712_v18 }
  0x87   : > { %689 = vmatprep.subr.bf16.mxu0 %v688_v63 }
  0x89   : > { %715 = vmatpush3.bf16.msra.mxu1 %v714_v21 }
  0x8a   : > { %691 = vmatpush1.bf16.msra.mxu0 %v690_v2  ;;  %717 = vmatprep.subr.bf16.mxu1 %v716_v24 }
  0x8d   : > { %379 = vmatmul.mubr.f32.vlgmr.msra.gmra.mrb[0].mxu0 %v269_v3  ;;  %719 = vmatpush3.bf16.msra.mxu1 %v718_v27 }
  0x8e   : > { %721 = vmatprep.subr.bf16.mxu1 %v720_v30 }
  0x91   : > { %723 = vmatpush3.bf16.msra.mxu1 %v722_v33 }
 0x160   : > { %v380_v41 = vpop.f32.mrb[0].mxu0 }
 0x161   : > { %v381_v42 = vadd.f32 %v380_v41, %v307_v39  ;;  %v382_v43 = vpop.f32.mrb[1].mxu0 }
 0x162   : > { %v383_v44 = vadd.f32 %v382_v43, %v311_v40 }
 0x163   : > { %v387_v45 = vmul.f32 0.70710677, %v381_v42  ;;  %v385_v52 = vmul.f32 0.5, %v381_v42 }
 0x164   : > { %v388_v46 = vmul.f32 0.70710677, %v383_v44  ;;  %v386_v50 = vmul.f32 0.5, %v383_v44 }
 0x165   : > { %796 = verf.f32 %v387_v45 }
 0x166   : > { %798 = verf.f32 %v388_v46 }
 0x16f   : > { %v797_v47 = vpop.eup %796 }
 0x170   : > { %v799_v48 = vpop.eup %798  ;;  %v391_v49 = vadd.f32 1.0, %v797_v47 }
 0x171   : > { %v392_v51 = vadd.f32 1.0, %v799_v48 }
 0x172   : > { %v393_v54 = vmul.f32 %v391_v49, %v385_v52 }
 0x173   : > { %v394_v53 = vmul.f32 %v392_v51, %v386_v50 }
 0x175   : > { %498 = vmatprep.mubr.f32.mxu1 %v394_v53 }
 0x176   : > { %499 = vmatmul.mubr.f32.vlgmr.msra.gmra.mrb[0].mxu1 %v393_v54 }
 0x249   : > { %v657_v55 = vpop.f32.mrb[0].mxu1 }
 0x24a   : > { %v658_v57 = vpop.f32.mrb[1].mxu1 }
 0x24b   : > { %v659_v58 = vadd.f32 %v658_v57, %v657_v55 }
 0x24d   : > { %v501_v59 = vadd.f32 %v659_v58, %v620_v56 }
 0x24f   : > { %504 = vst [vmem:[%s268_s13] sm:$0xff] %v501_v59 }
 0x250   : > { %899 = shalt.err (!%p896_p2)
}
 0x251   : > { %s900_s14 = scalar_lea.hbm %s1195_s8, 128  ;;  %s904_s26 = scalar_lea.hbm %s1244_s5, 256 }
 0x252   : > { %p901_p13 = scmp.ne.s32.totalorder %s1195_s8, %s900_s14  ;;  %p905_p4 = scmp.lt.u32.totalorder %s1195_s8, %s1244_s5 }
 0x253   : > { %p906_p7 = scmp.lt.u32.totalorder %s904_s26, %s900_s14  ;;  %p908_p11 = scmp.lt.u32.totalorder %s900_s14, %s1195_s8 }
 0x254   : > { %p902_p6 = pnand %p901_p13, %p1258_p0 }
 0x255   : > { %p907_p8 = por %p906_p7, %p905_p4 }
 0x256   : > { %p903_p10 = pneg %p902_p6 }
 0x257   : > { %p909_p1 = por %p908_p11, %p907_p8 }
 0x259   : > { %p910_p3 = pnand %p909_p1, %p903_p10 }
 0x25b   : > { %913 = shalt.err (!%p910_p3)
}
 0x25c   : > { %734 = dma.vmem_to_hbm [thread:$0]  (%p1258_p0), %s1197_s7, 128, %s1195_s8, %s506_s9  }
 0x25d PF: > { %s531_s12 = sand.u32 1, %s944_s18   ;;  %p1259_p5 = scmp.ne.s32.totalorder %s1249_s25, 0 }
 0x25e   : > { %p1260_p9 = scmp.ge.s32.totalorder %s956_s21, 2  ;;  %s532_s13 = scalar_lea.sflag [#allocation4], %s531_s12 }
 0x260   : > { %p748_p12 = pnand %p1260_p9, %p1259_p5 }
 0x262   : > { %939 = dma.done.wait (!%p748_p12), %s532_s13, 128  }
 0x263   : > { %941 = vsyncadd (!%p748_p12), %s532_s13, 4294967168  ;;  %p19_p2 = scmp.ge.s32.totalorder %s1107_s16, 4   ;;  %s1261_s18 = smov %s948_s19 }
 0x264   : > { %s1262_s19 = smov %s952_s20  ;;  %s1263_s20 = smov %s1116_s27 }
 0x265   : > { %s1264_s21 = smov %s1107_s16  ;;  %21 = sbr.rel (!%p19_p2) target bundleno = 6 (0x6), region = 93 }
 0x26c   :  { %537 = vsyncpa [#allocation3], 1 }
 0x26d   :  { %539 = vsyncpa [#allocation3 + $0x1], 1 }
 0x26e   :  { %540 = vsyncpa [#allocation6], 1 }
 0x26f   :  { %541 = vsyncpa [#allocation4], 1 }
 0x270   :  { %543 = vsyncpa [#allocation4 + $0x1], 1 }

</bundles_post_ra>
